<compile_context>
chip_gen: v7x
topology: tpu7x:2x2x1
jax: 0.10.0
libtpu: 0.0.40
codegen_flags: <defaults>
</compile_context>

<pallas_src>
import functools

import jax
import jax.numpy as jnp
from jax import lax
from jax.experimental import pallas as pl
from jax.experimental.pallas import tpu as pltpu


def _fused_kernel(x_ref, w_ref, o_ref, *, cout, inv_count, eps):
    # x_ref: (1, HW, 4*Cin)  bf16  packed shifted views [p0|p1|p2|p3] along K
    # w_ref: (4*Cin, 4*Cout) bf16  block-structured tap weights (zeros for unused taps)
    # o_ref: (1, HW, 4*Cout) bf16  packed parity quadrants [ee|eo|oe|oo] along lanes
    #
    # Single MXU matmul produces all 4 parity quadrants at once (f32 accumulation).
    y = jnp.dot(x_ref[0], w_ref[...], preferred_element_type=jnp.float32)  # (HW, 4*Cout)

    # InstanceNorm2d(affine=False): per-channel biased stats over all 4*HW positions,
    # single pass (sum & sum-of-squares) over the packed result, then fold the 4
    # quadrant groups per channel. (Conv bias omitted: cancelled by mean subtraction.)
    s1 = jnp.sum(y, axis=0, keepdims=True)          # (1, 4*Cout)
    s2 = jnp.sum(y * y, axis=0, keepdims=True)      # (1, 4*Cout)
    s1c = (s1[:, 0:cout] + s1[:, cout:2 * cout]
           + s1[:, 2 * cout:3 * cout] + s1[:, 3 * cout:4 * cout])   # (1, Cout)
    s2c = (s2[:, 0:cout] + s2[:, cout:2 * cout]
           + s2[:, 2 * cout:3 * cout] + s2[:, 3 * cout:4 * cout])   # (1, Cout)
    mu = s1c * inv_count
    # Clamp: E[y^2] - E[y]^2 can go slightly negative from cancellation -> NaN in rsqrt.
    var = jnp.maximum(s2c * inv_count - mu * mu, 0.0)
    scale = lax.rsqrt(var + eps)                    # EUP rsqrt
    shift = mu * scale

    # Broadcast per-channel scale/shift to the packed 4*Cout lane layout once.
    scale4 = jnp.concatenate([scale, scale, scale, scale], axis=1)   # (1, 4*Cout)
    shift4 = jnp.concatenate([shift, shift, shift, shift], axis=1)

    # Normalize + ReLU, bf16 writeback.
    o_ref[0] = jnp.maximum(y * scale4 - shift4, 0.0).astype(o_ref.dtype)


def _vmem_limit_bytes():
    # ~3/4 of physical VMEM, capped at 112 MiB: ~48 MiB on v7x (64 MiB physical),
    # ~96-112 MiB on v5e/v6e (128 MiB physical). Leaves headroom for compiler scratch
    # and double-buffered BlockSpec copies.
    cap = 64 * 1024 * 1024
    try:
        cap = getattr(pltpu.get_tpu_info(), "vmem_capacity_bytes", cap)
    except Exception:
        pass
    return min(int(cap * 3 // 4), 112 * 1024 * 1024)


def conv_transpose_block(x, w, b=None, *, eps=1e-5):
    """x: (N, Cin, H, W) f32 NCHW.  w: (Cin, Cout, 3, 3) = ConvTranspose2d.weight.
    b: (Cout,) ConvTranspose2d.bias -- accepted for API parity but unused: it is
    cancelled exactly by the affine=False InstanceNorm mean subtraction.
    Returns (N, Cout, 2H, 2W) f32 NCHW, matching the PyTorch module (norm='instance')."""
    del b
    N, Cin, H, W = x.shape
    Cout = w.shape[1]
    HW = H * W

    # ---- glue: packed LHS of the 4 one-pixel-shifted views (lane dim = 4*Cin) ----
    x_nhwc = jnp.transpose(x, (0, 2, 3, 1))                       # (N, H, W, Cin)
    xp = jnp.pad(x_nhwc, ((0, 0), (0, 1), (0, 1), (0, 0)))        # zero row/col at end
    p0 = xp[:, 0:H, 0:W, :]
    p1 = xp[:, 0:H, 1:W + 1, :]
    p2 = xp[:, 1:H + 1, 0:W, :]
    p3 = xp[:, 1:H + 1, 1:W + 1, :]
    lhs = jnp.concatenate([p0, p1, p2, p3], axis=-1)              # (N, H, W, 4*Cin)
    lhs = lhs.reshape(N, HW, 4 * Cin).astype(jnp.bfloat16)

    # ---- block-structured packed weight (4*Cin, 4*Cout): rows = [p0;p1;p2;p3],
    #      column blocks = quadrants [ee | eo | oe | oo] ----
    def tap(a, c):
        return w[:, :, a, c]
    Z = jnp.zeros((Cin, Cout), w.dtype)
    wp = jnp.concatenate([
        jnp.concatenate([tap(1, 1), tap(1, 2), tap(2, 1), tap(2, 2)], axis=1),  # p0
        jnp.concatenate([Z,         tap(1, 0), Z,         tap(2, 0)], axis=1),  # p1
        jnp.concatenate([Z,         Z,         tap(0, 1), tap(0, 2)], axis=1),  # p2
        jnp.concatenate([Z,         Z,         Z,         tap(0, 0)], axis=1),  # p3
    ], axis=0).astype(jnp.bfloat16)                               # (4*Cin, 4*Cout)

    out = pl.pallas_call(
        functools.partial(_fused_kernel, cout=Cout,
                          inv_count=1.0 / (4.0 * HW), eps=eps),
        out_shape=jax.ShapeDtypeStruct((N, HW, 4 * Cout), jnp.bfloat16),
        grid=(N,),
        in_specs=[
            pl.BlockSpec((1, HW, 4 * Cin), lambda n: (n, 0, 0)),
            pl.BlockSpec((4 * Cin, 4 * Cout), lambda n: (0, 0)),
        ],
        out_specs=pl.BlockSpec((1, HW, 4 * Cout), lambda n: (n, 0, 0)),
        compiler_params=pltpu.CompilerParams(
            dimension_semantics=("parallel",),
            vmem_limit_bytes=_vmem_limit_bytes()),
    )(lhs, wp)

    # Recombine parity quadrants into NCHW (bf16 -> half the transpose bytes vs f32):
    #   out[n, i*W+j, (rp*2+cp)*Cout + c] == y[n, c, 2i+rp, 2j+cp]
    o6 = out.reshape(N, H, W, 2, 2, Cout)                 # (n, i, j, rp, cp, c)
    y = jnp.transpose(o6, (0, 5, 1, 3, 2, 4))             # (n, c, i, rp, j, cp)
    return y.reshape(N, Cout, 2 * H, 2 * W).astype(jnp.float32)


def _reference(x, w, b, eps=1e-5):
    """Pure-JAX f32 reference for ConvTranspose2d(3,2,1,1,bias) + InstanceNorm2d + ReLU."""
    rhs = jnp.transpose(w, (1, 0, 2, 3))[:, :, ::-1, ::-1]              # (Cout, Cin, 3, 3)
    y = lax.conv_general_dilated(
        x, rhs, window_strides=(1, 1), padding=[(1, 2), (1, 2)],
        lhs_dilation=(2, 2), rhs_dilation=(1, 1),
        dimension_numbers=("NCHW", "OIHW", "NCHW"),
        precision=lax.Precision.HIGHEST)
    y = y + b[None, :, None, None]
    mu = jnp.mean(y, axis=(2, 3), keepdims=True)
    var = jnp.mean((y - mu) ** 2, axis=(2, 3), keepdims=True)
    return jnp.maximum((y - mu) / jnp.sqrt(var + eps), 0.0)


if __name__ == "__main__":
    key = jax.random.PRNGKey(0)
    kx, kw, kb = jax.random.split(key, 3)

    N, Cin, Cout, H, W = 2, 4, 8, 16, 16
    x = jax.random.normal(kx, (N, Cin, H, W), jnp.float32)
    w = jax.random.normal(kw, (Cin, Cout, 3, 3), jnp.float32) * 0.1     # ConvTranspose2d.weight
    b = jax.random.normal(kb, (Cout,), jnp.float32) * 0.1               # ConvTranspose2d.bias

    fn = jax.jit(conv_transpose_block)
    out = jax.block_until_ready(fn(x, w, b))
    assert out.shape == (N, Cout, 2 * H, 2 * W), out.shape

    # Tight check: reference fed the same bf16-rounded operands the kernel's GEMM sees
    # (isolates parity packing + fused single-pass norm + bf16 writeback rounding).
    xq = x.astype(jnp.bfloat16).astype(jnp.float32)
    wq = w.astype(jnp.bfloat16).astype(jnp.float32)
    err_q = float(jnp.max(jnp.abs(out - _reference(xq, wq, b))))
    assert err_q < 2.5e-2, err_q

    # Loose check vs the full-f32 module semantics (slack = bf16 operand/output rounding).
    err = float(jnp.max(jnp.abs(out - _reference(x, w, b))))
    assert err < 8e-2, err

    print("KERNEL_OK")
</pallas_src>

<mosaic_0001>
module attributes {stable_mosaic.version = 11 : i64} {
  func.func @_fused_kernel(%arg0: i32, %arg1: memref<1x256x16xbf16, #tpu.memory_space<vmem>>, %arg2: memref<16x32xbf16, #tpu.memory_space<vmem>>, %arg3: memref<1x256x32xbf16, #tpu.memory_space<vmem>>) attributes {dimension_semantics = [#tpu.dimension_semantics<parallel>], iteration_bounds = array<i64: 2>, scalar_prefetch = 0 : i64, scratch_operands = 0 : i64, tpu.core_type = #tpu.core_type<tc>, window_params = [{transform_indices = @transform_0, window_bounds = array<i64: 1, 256, 16>}, {pipeline_mode = #tpu.pipeline_mode<synchronous>, transform_indices = @transform_1, window_bounds = array<i64: 16, 32>}, {transform_indices = @transform_2, window_bounds = array<i64: 1, 256, 32>}]} {
    %c0 = arith.constant 0 : index
    %c0_0 = arith.constant 0 : index
    %c0_1 = arith.constant 0 : index
    %0 = vector.load %arg1[%c0, %c0_0, %c0_1] : memref<1x256x16xbf16, #tpu.memory_space<vmem>>, vector<1x256x16xbf16>
    %1 = vector.shape_cast %0 : vector<1x256x16xbf16> to vector<256x16xbf16>
    %c0_2 = arith.constant 0 : index
    %c0_3 = arith.constant 0 : index
    %2 = vector.load %arg2[%c0_2, %c0_3] : memref<16x32xbf16, #tpu.memory_space<vmem>>, vector<16x32xbf16>
    %cst = arith.constant dense<0.000000e+00> : vector<256x32xf32>
    %3 = tpu.matmul %1, %2, %cst {dimension_numbers = #tpu.dot_dimension_numbers<[1], [0], [0], [1], [0, 0, 1, 1], [], []>} : vector<256x16xbf16>, vector<16x32xbf16>, vector<256x32xf32> -> vector<256x32xf32>
    %cst_4 = arith.constant dense<0.000000e+00> : vector<32xf32>
    %4 = vector.multi_reduction <add>, %3, %cst_4 [0] : vector<256x32xf32> to vector<32xf32>
    %5 = vector.shape_cast %4 : vector<32xf32> to vector<1x32xf32>
    %6 = arith.mulf %3, %3 : vector<256x32xf32>
    %cst_5 = arith.constant dense<0.000000e+00> : vector<32xf32>
    %7 = vector.multi_reduction <add>, %6, %cst_5 [0] : vector<256x32xf32> to vector<32xf32>
    %8 = vector.shape_cast %7 : vector<32xf32> to vector<1x32xf32>
    %9 = vector.extract_strided_slice %5 {offsets = [0, 0], sizes = [1, 8], strides = [1, 1]} : vector<1x32xf32> to vector<1x8xf32>
    %10 = vector.extract_strided_slice %5 {offsets = [0, 8], sizes = [1, 8], strides = [1, 1]} : vector<1x32xf32> to vector<1x8xf32>
    %11 = arith.addf %9, %10 : vector<1x8xf32>
    %12 = vector.extract_strided_slice %5 {offsets = [0, 16], sizes = [1, 8], strides = [1, 1]} : vector<1x32xf32> to vector<1x8xf32>
    %13 = arith.addf %11, %12 : vector<1x8xf32>
    %14 = vector.extract_strided_slice %5 {offsets = [0, 24], sizes = [1, 8], strides = [1, 1]} : vector<1x32xf32> to vector<1x8xf32>
    %15 = arith.addf %13, %14 : vector<1x8xf32>
    %16 = vector.extract_strided_slice %8 {offsets = [0, 0], sizes = [1, 8], strides = [1, 1]} : vector<1x32xf32> to vector<1x8xf32>
    %17 = vector.extract_strided_slice %8 {offsets = [0, 8], sizes = [1, 8], strides = [1, 1]} : vector<1x32xf32> to vector<1x8xf32>
    %18 = arith.addf %16, %17 : vector<1x8xf32>
    %19 = vector.extract_strided_slice %8 {offsets = [0, 16], sizes = [1, 8], strides = [1, 1]} : vector<1x32xf32> to vector<1x8xf32>
    %20 = arith.addf %18, %19 : vector<1x8xf32>
    %21 = vector.extract_strided_slice %8 {offsets = [0, 24], sizes = [1, 8], strides = [1, 1]} : vector<1x32xf32> to vector<1x8xf32>
    %22 = arith.addf %20, %21 : vector<1x8xf32>
    %cst_6 = arith.constant 9.765625E-4 : f32
    %23 = vector.broadcast %cst_6 : f32 to vector<1x8xf32>
    %24 = arith.mulf %15, %23 : vector<1x8xf32>
    %cst_7 = arith.constant 9.765625E-4 : f32
    %25 = vector.broadcast %cst_7 : f32 to vector<1x8xf32>
    %26 = arith.mulf %22, %25 : vector<1x8xf32>
    %27 = arith.mulf %24, %24 : vector<1x8xf32>
    %28 = arith.subf %26, %27 : vector<1x8xf32>
    %cst_8 = arith.constant 0.000000e+00 : f32
    %29 = vector.broadcast %cst_8 : f32 to vector<1x8xf32>
    %30 = arith.maximumf %28, %29 : vector<1x8xf32>
    %cst_9 = arith.constant 9.99999974E-6 : f32
    %31 = vector.broadcast %cst_9 : f32 to vector<1x8xf32>
    %32 = arith.addf %30, %31 : vector<1x8xf32>
    %33 = math.rsqrt %32 : vector<1x8xf32>
    %34 = arith.mulf %24, %33 : vector<1x8xf32>
    %35 = tpu.concatenate %33, %33, %33, %33 in 1 : vector<1x8xf32>, vector<1x8xf32>, vector<1x8xf32>, vector<1x8xf32> -> vector<1x32xf32>
    %36 = tpu.concatenate %34, %34, %34, %34 in 1 : vector<1x8xf32>, vector<1x8xf32>, vector<1x8xf32>, vector<1x8xf32> -> vector<1x32xf32>
    %37 = vector.broadcast %35 : vector<1x32xf32> to vector<256x32xf32>
    %38 = arith.mulf %3, %37 : vector<256x32xf32>
    %39 = vector.broadcast %36 : vector<1x32xf32> to vector<256x32xf32>
    %40 = arith.subf %38, %39 : vector<256x32xf32>
    %cst_10 = arith.constant 0.000000e+00 : f32
    %41 = vector.broadcast %cst_10 : f32 to vector<256x32xf32>
    %42 = arith.maximumf %40, %41 : vector<256x32xf32>
    %43 = arith.truncf %42 : vector<256x32xf32> to vector<256x32xbf16>
    %c0_11 = arith.constant 0 : index
    %c0_12 = arith.constant 0 : index
    %c0_13 = arith.constant 0 : index
    %44 = vector.load %arg3[%c0_11, %c0_12, %c0_13] : memref<1x256x32xbf16, #tpu.memory_space<vmem>>, vector<1x256x32xbf16>
    %45 = vector.shape_cast %44 : vector<1x256x32xbf16> to vector<256x32xbf16>
    %46 = vector.shape_cast %43 : vector<256x32xbf16> to vector<1x256x32xbf16>
    tpu.vector_store %arg3[%c0_11, %c0_12, %c0_13], %46 {strides = array<i32>} : memref<1x256x32xbf16, #tpu.memory_space<vmem>>, vector<1x256x32xbf16>,
    return
  }
  func.func @transform_0(%arg0: i32) -> (i32, i32, i32) {
    %c0_i32 = arith.constant 0 : i32
    %c0_i32_0 = arith.constant 0 : i32
    %c0_i32_1 = arith.constant 0 : i32
    return %arg0, %c0_i32, %c0_i32_0 : i32, i32, i32
  }
  func.func @transform_1(%arg0: i32) -> (i32, i32) {
    %c0_i32 = arith.constant 0 : i32
    %c0_i32_0 = arith.constant 0 : i32
    %c0_i32_1 = arith.constant 0 : i32
    return %c0_i32, %c0_i32_0 : i32, i32
  }
  func.func @transform_2(%arg0: i32) -> (i32, i32, i32) {
    %c0_i32 = arith.constant 0 : i32
    %c0_i32_0 = arith.constant 0 : i32
    %c0_i32_1 = arith.constant 0 : i32
    return %arg0, %c0_i32, %c0_i32_0 : i32, i32, i32
  }
}

</mosaic_0001>

<bundles_post_ra>
// kernel: conv_transpose_block.1
= control target key start
LH: loop header
LB: loop body
LE: loop exit
PB: predicated region body
PF: predicated region fallthrough
CT: control target
= control target key end

     0   :  { %s1253_s9 = smov 0   ;;  %s1821_s0 = inlined_call_operand.vmem [shape: bf16[2,256,16], index: 0, kind: input, shape index: {}]   ;;  %s1822_s1 = inlined_call_operand.vmem [shape: bf16[16,32], index: 1, kind: input, shape index: {}]   ;;  %s1823_s2 = inlined_call_operand.vmem [shape: bf16[2,256,32], index: 2, kind: output, shape index: {}]  }
   0x1 LB: > { %s1028_s10 = sadd.s32 4294967295, %s1230_s9   ;;  %p1032_p0 = scmp.ge.s32.totalorder %s1230_s9, 1  ;;  %s1230_s9 = sphi %s1253_s9, %s12_s9  }
   0x2   : > { %p112_p1 = scmp.lt.s32.totalorder %s1230_s9, 3 }
   0x4   : > { %p113_p2 = pnand %p1032_p0, %p112_p1 }
   0x5   : > { %v1205_v0 = vld [vmem:[%s1822_s1] sm:$0xff] (!%p113_p2)   ;;  %p134_p3 = scmp.lt.s32.totalorder (!%p113_p2), %s1028_s10, 1  ;;  %vm265_vm0 = vcmask (!%p113_p2), 130048   ;;  %vm475_vm1 = vcmask (!%p113_p2), 261120   ;;  %s1232_s17 = smov (!%p113_p2), 104   ;;  %vm690_vm2 = vcmask (!%p113_p2), 64512  }
   0x6   : > { %116 = sbr.rel (%p113_p2) target bundleno = 620 (0x26c), region = 28  ;;  %1155 = vmatprep.subr.bf16.mxu0 (!%p113_p2), %v1205_v0  ;;  %1189 = vmatprep.subr.bf16.mxu1 (!%p113_p2), %v1205_v0  ;;  %s1233_s18 = smov (!%p113_p2), 120   ;;  %vm693_vm3 = vcmask (!%p113_p2), 195584   ;;  %vm940_vm4 = vcmask (!%p113_p2), 257024  }
   0x7   : > { %1156 = vmatpush3.bf16.msra.mxu0 (!%p113_p2), %v1205_v0  ;;  %1190 = vmatpush3.bf16.msra.mxu1 (!%p113_p2), %v1205_v0  ;;  %s1234_s19 = smov (!%p113_p2), 112   ;;  %s1235_s20 = smov (!%p113_p2), 16  }
   0x8   : > { %s1236_s21 = smov (!%p113_p2), 8   ;;  %s1237_s22 = smov (!%p113_p2), 24  }
   0xd   : > { %s1825_s10 = smov (!%p134_p3, %s1028_s10), 1 }
   0xe   : > { %s1104_s13 = sshll.u32 %s1825_s10, 7 }
   0xf   : > { %s1272_s16 = scalar_lea.vmem %s1821_s0, %s1104_s13  ;;  %s1720_s25 = scalar_lea.vmem %s1823_s2, %s1104_s13 }
  0x10   : > { %v1206_v1 = vld [vmem:[%s1272_s16] sm:$0xff]   ;;  %v1207_v2 = vld [vmem:[%s1272_s16 + $0x8] sm:$0xff]   ;;  %v1208_v3 = vld [vmem:[%s1272_s16 + $0x10] sm:$0xff]  }
  0x11   : > { %1157 = vmatprep.mubr.msk.bf16.mxu0 %vm265_vm0, %v1206_v1  ;;  %v1209_v4 = vld [vmem:[%s1272_s16 + $0x18] sm:$0xff]   ;;  %v1210_v5 = vld [vmem:[%s1272_s16 + $0x20] sm:$0xff]   ;;  %v1215_v7 = vld [vmem:[%s1272_s16 + $0x48] sm:$0xff]  }
  0x12   : > { %1158 = vmatmul.mubr.msk.bf16.vlgmr.msra.gmra.mrb[0].mxu0 %vm265_vm0, %v1207_v2  ;;  %v1214_v6 = vld [vmem:[%s1272_s16 + $0x40] sm:$0xff]   ;;  %v1216_v8 = vld [vmem:[%s1272_s16 + $0x50] sm:$0xff]   ;;  %v1211_v9 = vld [vmem:[%s1272_s16 + $0x28] sm:$0xff]  }
  0x13   : > { %1161 = vmatprep.mubr.msk.bf16.mxu0 %vm265_vm0, %v1208_v3  ;;  %1173 = vmatprep.mubr.msk.bf16.mxu1 %vm265_vm0, %v1214_v6  ;;  %v1217_v10 = vld [vmem:[%s1272_s16 + $0x58] sm:$0xff]   ;;  %v1212_v11 = vld [vmem:[%s1272_s16 + $0x30] sm:$0xff]   ;;  %v1218_v12 = vld [vmem:[%s1272_s16 + $0x60] sm:$0xff]  }
  0x14   : > { %1174 = vmatmul.mubr.msk.bf16.vlgmr.msra.gmra.mrb[0].mxu1 %vm265_vm0, %v1215_v7  ;;  %v1213_v13 = vld [vmem:[%s1272_s16 + $0x38] sm:$0xff]   ;;  %v1219_v14 = vld [vmem:[%s1272_s16 + $0x68] sm:$0xff]   ;;  %v1220_v15 = vld [vmem:[%s1272_s16 + $0x70] sm:$0xff]  }
  0x15   : > { %1177 = vmatprep.mubr.msk.bf16.mxu1 %vm265_vm0, %v1216_v8  ;;  %v1221_v16 = vld [vmem:[%s1272_s16 + $0x78] sm:$0xff]  }
  0x1a   : > { %1162 = vmatmul.mubr.msk.bf16.gmra.mrb[4].mxu0 %vm265_vm0, %v1209_v4 }
  0x1b   : > { %1165 = vmatprep.mubr.msk.bf16.mxu0 %vm265_vm0, %v1210_v5 }
  0x1c   : > { %1178 = vmatmul.mubr.msk.bf16.gmra.mrb[4].mxu1 %vm265_vm0, %v1217_v10 }
  0x1d   : > { %1181 = vmatprep.mubr.msk.bf16.mxu1 %vm265_vm0, %v1218_v12 }
  0x22   : > { %1166 = vmatmul.mubr.msk.bf16.gmra.mrb[8].mxu0 %vm265_vm0, %v1211_v9 }
  0x23   : > { %1169 = vmatprep.mubr.msk.bf16.mxu0 %vm265_vm0, %v1212_v11 }
  0x24   : > { %1182 = vmatmul.mubr.msk.bf16.gmra.mrb[8].mxu1 %vm265_vm0, %v1219_v14 }
  0x25   : > { %1185 = vmatprep.mubr.msk.bf16.mxu1 %vm265_vm0, %v1220_v15 }
  0x2a   : > { %1170 = vmatmul.mubr.msk.bf16.gmra.mrb[12].mxu0 %vm265_vm0, %v1213_v13 }
  0x2c   : > { %1186 = vmatmul.mubr.msk.bf16.gmra.mrb[12].mxu1 %vm265_vm0, %v1221_v16 }
  0xe5   : > { %v1306_v17 = vpop.f32.mrb[0].mxu0 }
  0xe6   : > { %v1308_v18 = vpop.f32.mrb[1].mxu0  ;;  %v547_v22 = vmul.f32 %v1306_v17, %v1306_v17  ;;  %v479_v27 = vsel %vm475_vm1, %v1306_v17, 0.0 }
  0xe7   : > { %v545_v19 = vmul.f32 %v1308_v18, %v1308_v18  ;;  %v1312_v20 = vpop.f32.mrb[2].mxu0  ;;  %v476_v23 = vsel %vm475_vm1, %v1308_v18, 0.0  ;;  %v1335_v36 = vpop.f32.mrb[0].mxu1 }
  0xe8   : > { %v1314_v21 = vpop.f32.mrb[3].mxu0  ;;  %v548_v29 = vmul.f32 %v1312_v20, %v1312_v20  ;;  %v580_v33 = vsel %vm475_vm1, %v547_v22, 0.0  ;;  %v481_v34 = vsel %vm475_vm1, %v1312_v20, 0.0  ;;  %v1339_v40 = vpop.f32.mrb[1].mxu1 }
  0xe9   : > { %v477_v24 = vsel %vm475_vm1, %v1314_v21, 0.0  ;;  %v546_v25 = vmul.f32 %v1314_v21, %v1314_v21  ;;  %v577_v28 = vsel %vm475_vm1, %v545_v19, 0.0  ;;  %v1348_v45 = vpop.f32.mrb[2].mxu1 }
  0xea   : > { %v478_v26 = vadd.f32 %v477_v24, %v476_v23  ;;  %v582_v41 = vsel %vm475_vm1, %v548_v29, 0.0  ;;  %v1352_v49 = vpop.f32.mrb[3].mxu1 }
  0xeb   : > { %v578_v30 = vsel %vm475_vm1, %v546_v25, 0.0 }
  0xec   : > { %v480_v31 = vadd.f32 %v479_v27, %v478_v26  ;;  %v579_v32 = vadd.f32 %v578_v30, %v577_v28 }
  0xed   : > { %v1333_v35 = vpop.f32.mrb[4].mxu0 }
  0xee   : > { %v581_v37 = vadd.f32 %v580_v33, %v579_v32  ;;  %v1337_v38 = vpop.f32.mrb[5].mxu0  ;;  %v482_v39 = vadd.f32 %v481_v34, %v480_v31  ;;  %v551_v50 = vmul.f32 %v1333_v35, %v1333_v35  ;;  %v487_v56 = vsel %vm475_vm1, %v1333_v35, 0.0 }
  0xef   : > { %v483_v42 = vsel %vm475_vm1, %v1337_v38, 0.0  ;;  %v549_v43 = vmul.f32 %v1337_v38, %v1337_v38  ;;  %v1346_v44 = vpop.f32.mrb[6].mxu0  ;;  %v1371_v0 = vpop.f32.mrb[4].mxu1 }
  0xf0   : > { %v484_v46 = vadd.f32 %v483_v42, %v482_v39  ;;  %v583_v47 = vadd.f32 %v582_v41, %v581_v37  ;;  %v1350_v48 = vpop.f32.mrb[7].mxu0  ;;  %v552_v57 = vmul.f32 %v1346_v44, %v1346_v44  ;;  %v588_v61 = vsel %vm475_vm1, %v551_v50, 0.0  ;;  %v1375_v4 = vpop.f32.mrb[5].mxu1 }
  0xf1   : > { %v584_v51 = vsel %vm475_vm1, %v549_v43, 0.0  ;;  %v485_v52 = vsel %vm475_vm1, %v1350_v48, 0.0  ;;  %v550_v53 = vmul.f32 %v1350_v48, %v1350_v48  ;;  %v489_v62 = vsel %vm475_vm1, %v1346_v44, 0.0  ;;  %v1384_v9 = vpop.f32.mrb[6].mxu1 }
  0xf2   : > { %v585_v54 = vadd.f32 %v584_v51, %v583_v47  ;;  %v486_v55 = vadd.f32 %v485_v52, %v484_v46  ;;  %v590_v5 = vsel %vm475_vm1, %v552_v57, 0.0  ;;  %v1388_v13 = vpop.f32.mrb[7].mxu1 }
  0xf3   : > { %v586_v58 = vsel %vm475_vm1, %v550_v53, 0.0 }
  0xf4   : > { %v488_v59 = vadd.f32 %v487_v56, %v486_v55  ;;  %v587_v60 = vadd.f32 %v586_v58, %v585_v54 }
  0xf5   : > { %v1369_v63 = vpop.f32.mrb[8].mxu0 }
  0xf6   : > { %v589_v1 = vadd.f32 %v588_v61, %v587_v60  ;;  %v1373_v2 = vpop.f32.mrb[9].mxu0  ;;  %v490_v3 = vadd.f32 %v489_v62, %v488_v59  ;;  %v555_v14 = vmul.f32 %v1369_v63, %v1369_v63  ;;  %v495_v24 = vsel %vm475_vm1, %v1369_v63, 0.0 }
  0xf7   : > { %v491_v6 = vsel %vm475_vm1, %v1373_v2, 0.0  ;;  %v553_v7 = vmul.f32 %v1373_v2, %v1373_v2  ;;  %v1382_v8 = vpop.f32.mrb[10].mxu0  ;;  %v1407_v32 = vpop.f32.mrb[8].mxu1 }
  0xf8   : > { %v492_v10 = vadd.f32 %v491_v6, %v490_v3  ;;  %v591_v11 = vadd.f32 %v590_v5, %v589_v1  ;;  %v1386_v12 = vpop.f32.mrb[11].mxu0  ;;  %v556_v25 = vmul.f32 %v1382_v8, %v1382_v8  ;;  %v596_v29 = vsel %vm475_vm1, %v555_v14, 0.0  ;;  %v1411_v39 = vpop.f32.mrb[9].mxu1 }
  0xf9   : > { %v592_v15 = vsel %vm475_vm1, %v553_v7, 0.0  ;;  %v493_v16 = vsel %vm475_vm1, %v1386_v12, 0.0  ;;  %v554_v19 = vmul.f32 %v1386_v12, %v1386_v12  ;;  %v497_v30 = vsel %vm475_vm1, %v1382_v8, 0.0  ;;  %v1420_v47 = vpop.f32.mrb[10].mxu1 }
  0xfa   : > { %v593_v22 = vadd.f32 %v592_v15, %v591_v11  ;;  %v494_v23 = vadd.f32 %v493_v16, %v492_v10  ;;  %v598_v41 = vsel %vm475_vm1, %v556_v25, 0.0  ;;  %v1424_v53 = vpop.f32.mrb[11].mxu1  ;;  %v561_v1 = vmul.f32 %v1339_v40, %v1339_v40 }
  0xfb   : > { %v594_v26 = vsel %vm475_vm1, %v554_v19, 0.0  ;;  %v507_v10 = vsel %vm475_vm1, %v1339_v40, 0.0 }
  0xfc   : > { %v496_v27 = vadd.f32 %v495_v24, %v494_v23  ;;  %v595_v28 = vadd.f32 %v594_v26, %v593_v22  ;;  %v608_v22 = vsel %vm475_vm1, %v561_v1, 0.0  ;;  %v562_v23 = vmul.f32 %v1352_v49, %v1352_v49 }
  0xfd   : > { %v1405_v31 = vpop.f32.mrb[12].mxu0  ;;  %v566_v1 = vmul.f32 %v1388_v13, %v1388_v13 }
  0xfe   : > { %v597_v33 = vadd.f32 %v596_v29, %v595_v28  ;;  %v1409_v34 = vpop.f32.mrb[13].mxu0  ;;  %v498_v37 = vadd.f32 %v497_v30, %v496_v27  ;;  %v559_v54 = vmul.f32 %v1405_v31, %v1405_v31  ;;  %v503_v60 = vsel %vm475_vm1, %v1405_v31, 0.0 }
  0xff   : > { %v499_v42 = vsel %vm475_vm1, %v1409_v34, 0.0  ;;  %v557_v43 = vmul.f32 %v1409_v34, %v1409_v34  ;;  %v1418_v46 = vpop.f32.mrb[14].mxu0  ;;  %v1445_v11 = vpop.f32.mrb[12].mxu1  ;;  %v563_v28 = vmul.f32 %v1335_v36, %v1335_v36  ;;  %v509_v29 = vsel %vm475_vm1, %v1352_v49, 0.0 }
 0x100   : > { %v500_v50 = vadd.f32 %v499_v42, %v498_v37  ;;  %v599_v51 = vadd.f32 %v598_v41, %v597_v33  ;;  %v1422_v52 = vpop.f32.mrb[15].mxu0  ;;  %v560_v61 = vmul.f32 %v1418_v46, %v1418_v46  ;;  %v604_v6 = vsel %vm475_vm1, %v559_v54, 0.0  ;;  %v1447_v16 = vpop.f32.mrb[13].mxu1 }
 0x101   : > { %v600_v55 = vsel %vm475_vm1, %v557_v43, 0.0  ;;  %v501_v56 = vsel %vm475_vm1, %v1422_v52, 0.0  ;;  %v558_v57 = vmul.f32 %v1422_v52, %v1422_v52  ;;  %v505_v7 = vsel %vm475_vm1, %v1418_v46, 0.0  ;;  %v1453_v24 = vpop.f32.mrb[14].mxu1 }
 0x102   : > { %v601_v58 = vadd.f32 %v600_v55, %v599_v51  ;;  %v502_v59 = vadd.f32 %v501_v56, %v500_v50  ;;  %v606_v19 = vsel %vm475_vm1, %v560_v61, 0.0  ;;  %v1455_v27 = vpop.f32.mrb[15].mxu1  ;;  %v576_v30 = vmul.f32 %v1453_v24, %v1453_v24 }
 0x103   : > { %v602_v62 = vsel %vm475_vm1, %v558_v57, 0.0  ;;  %v511_v33 = vsel %vm475_vm1, %v1335_v36, 0.0  ;;  %v564_v42 = vmul.f32 %v1348_v45, %v1348_v45  ;;  %v610_v43 = vsel %vm475_vm1, %v562_v23, 0.0 }
 0x104   : > { %v504_v3 = vadd.f32 %v503_v60, %v502_v59  ;;  %v603_v5 = vadd.f32 %v602_v62, %v601_v58  ;;  %v565_v50 = vmul.f32 %v1375_v4, %v1375_v4  ;;  %v1471_v51 = vsel %vm475_vm1, %v576_v30, 0.0 }
 0x105   : > { %v612_v56 = vsel %vm475_vm1, %v563_v28, 0.0  ;;  %v513_v57 = vsel %vm475_vm1, %v1348_v45, 0.0  ;;  %v515_v58 = vsel %vm475_vm1, %v1375_v4, 0.0  ;;  %v614_v61 = vsel %vm475_vm1, %v564_v42, 0.0 }
 0x106   : > { %v605_v14 = vadd.f32 %v604_v6, %v603_v5  ;;  %v506_v15 = vadd.f32 %v505_v7, %v504_v3  ;;  %v616_v62 = vsel %vm475_vm1, %v565_v50, 0.0  ;;  %v567_v6 = vmul.f32 %v1371_v0, %v1371_v0 }
 0x107   : > { %v517_v7 = vsel %vm475_vm1, %v1388_v13, 0.0  ;;  %v569_v23 = vmul.f32 %v1411_v39, %v1411_v39  ;;  %v523_v30 = vsel %vm475_vm1, %v1411_v39, 0.0 }
 0x108   : > { %v508_v25 = vadd.f32 %v507_v10, %v506_v15  ;;  %v607_v26 = vadd.f32 %v606_v19, %v605_v14  ;;  %v519_v15 = vsel %vm475_vm1, %v1371_v0, 0.0  ;;  %v568_v19 = vmul.f32 %v1384_v9, %v1384_v9 }
 0x109   : > { %v620_v28 = vsel %vm475_vm1, %v567_v6, 0.0  ;;  %v624_v42 = vsel %vm475_vm1, %v569_v23, 0.0  ;;  %v529_v6 = vsel %vm475_vm1, %v1420_v47, 0.0 }
 0x10a   : > { %v609_v37 = vadd.f32 %v608_v22, %v607_v26  ;;  %v510_v41 = vadd.f32 %v509_v29, %v508_v25  ;;  %v618_v22 = vsel %vm475_vm1, %v566_v1, 0.0  ;;  %v521_v29 = vsel %vm475_vm1, %v1384_v9, 0.0 }
 0x10c   : > { %v512_v54 = vadd.f32 %v511_v33, %v510_v41  ;;  %v611_v55 = vadd.f32 %v610_v43, %v609_v37  ;;  %v622_v41 = vsel %vm475_vm1, %v568_v19, 0.0  ;;  %v570_v43 = vmul.f32 %v1424_v53, %v1424_v53 }
 0x10e   : > { %v613_v59 = vadd.f32 %v612_v56, %v611_v55  ;;  %v514_v60 = vadd.f32 %v513_v57, %v512_v54  ;;  %v571_v55 = vmul.f32 %v1407_v32, %v1407_v32  ;;  %v525_v56 = vsel %vm475_vm1, %v1424_v53, 0.0 }
 0x110   : > { %v516_v3 = vadd.f32 %v515_v58, %v514_v60  ;;  %v615_v5 = vadd.f32 %v614_v61, %v613_v59  ;;  %v527_v59 = vsel %vm475_vm1, %v1407_v32, 0.0  ;;  %v572_v60 = vmul.f32 %v1420_v47, %v1420_v47 }
 0x111   : > { %v626_v61 = vsel %vm475_vm1, %v570_v43, 0.0 }
 0x112   : > { %v617_v10 = vadd.f32 %v616_v62, %v615_v5  ;;  %v518_v14 = vadd.f32 %v517_v7, %v516_v3  ;;  %v573_v62 = vmul.f32 %v1447_v16, %v1447_v16  ;;  %v628_v5 = vsel %vm475_vm1, %v571_v55, 0.0 }
 0x113   : > { %v531_v7 = vsel %vm475_vm1, %v1447_v16, 0.0 }
 0x114   : > { %v520_v25 = vadd.f32 %v519_v15, %v518_v14  ;;  %v619_v26 = vadd.f32 %v618_v22, %v617_v10  ;;  %v630_v15 = vsel %vm475_vm1, %v572_v60, 0.0  ;;  %v632_v19 = vsel %vm475_vm1, %v573_v62, 0.0 }
 0x115   : > { %v574_v22 = vmul.f32 %v1455_v27, %v1455_v27 }
 0x116   : > { %v621_v33 = vadd.f32 %v620_v28, %v619_v26  ;;  %v522_v37 = vadd.f32 %v521_v29, %v520_v25  ;;  %v575_v26 = vmul.f32 %v1445_v11, %v1445_v11  ;;  %v533_v28 = vsel %vm475_vm1, %v1455_v27, 0.0 }
 0x118   : > { %v524_v50 = vadd.f32 %v523_v30, %v522_v37  ;;  %v623_v54 = vadd.f32 %v622_v41, %v621_v33  ;;  %v535_v33 = vsel %vm475_vm1, %v1445_v11, 0.0  ;;  %v634_v37 = vsel %vm475_vm1, %v574_v22, 0.0 }
 0x119   : > { %v636_v43 = vsel %vm475_vm1, %v575_v26, 0.0 }
 0x11a   : > { %v625_v57 = vadd.f32 %v624_v42, %v623_v54  ;;  %v526_v58 = vadd.f32 %v525_v56, %v524_v50  ;;  %v537_v50 = vsel %vm475_vm1, %v1453_v24, 0.0 }
 0x11c   : > { %v528_v1 = vadd.f32 %v527_v59, %v526_v58  ;;  %v627_v3 = vadd.f32 %v626_v61, %v625_v57 }
 0x11e   : > { %v629_v10 = vadd.f32 %v628_v5, %v627_v3  ;;  %v530_v14 = vadd.f32 %v529_v6, %v528_v1 }
 0x120   : > { %v532_v23 = vadd.f32 %v531_v7, %v530_v14  ;;  %v631_v25 = vadd.f32 %v630_v15, %v629_v10 }
 0x122   : > { %v633_v29 = vadd.f32 %v632_v19, %v631_v25  ;;  %v534_v30 = vadd.f32 %v533_v28, %v532_v23 }
 0x124   : > { %v536_v41 = vadd.f32 %v535_v33, %v534_v30  ;;  %v635_v42 = vadd.f32 %v634_v37, %v633_v29 }
 0x126   : > { %v538_v54 = vadd.f32 %v537_v50, %v536_v41  ;;  %v637_v55 = vadd.f32 %v636_v43, %v635_v42 }
 0x128   : > { %v539_v56 = vrot.slane %v538_v54, 4  ;;  %v639_v57 = vadd.f32 %v1471_v51, %v637_v55 }
 0x12a   : > { %v540_v58 = vadd.f32 %v539_v56, %v538_v54  ;;  %v640_v59 = vrot.slane %v639_v57, 4 }
 0x12c   : > { %v541_v60 = vrot.slane %v540_v58, 2  ;;  %v641_v61 = vadd.f32 %v640_v59, %v639_v57  ;;  %v708_v57 = vlaneseq }
 0x12e   : > { %v542_v62 = vadd.f32 %v541_v60, %v540_v58  ;;  %v642_v1 = vrot.slane %v641_v61, 2  ;;  %v709_v58 = vshrl.u32 %v708_v57, 7 }
 0x130   : > { %v543_v3 = vrot.slane %v542_v62, 1  ;;  %v643_v5 = vadd.f32 %v642_v1, %v641_v61 }
 0x132   : > { %v544_v6 = vadd.f32 %v543_v3, %v542_v62  ;;  %v644_v7 = vrot.slane %v643_v5, 1  ;;  %v710_v62 = vsub.s32 0, %v709_v58 }
 0x134   : > { %655 = vrot.lane.b32.xlu1 %v544_v6, %s1232_s17  ;;  %647 = vrot.lane.b32.xlu0 %v544_v6, %s1233_s18  ;;  %v645_v10 = vadd.f32 %v644_v7, %v643_v5 }
 0x138   : > { %660 = vrot.lane.b32.xlu1 %v645_v10, %s1233_s18  ;;  %651 = vrot.lane.b32.xlu0 %v544_v6, %s1234_s19 }
 0x13c   : > { %668 = vrot.lane.b32.xlu1 %v645_v10, %s1232_s17  ;;  %664 = vrot.lane.b32.xlu0 %v645_v10, %s1234_s19 }
 0x1a6   : > { %v656_v51 = vpop.permute.xlu1 %655  ;;  %v648_v14 = vpop.permute.xlu0 %647 }
 0x1a7   : > { %v650_v15 = vadd.f32 %v648_v14, %v544_v6 }
 0x1aa   : > { %v661_v19 = vpop.permute.xlu1 %660  ;;  %v652_v22 = vpop.permute.xlu0 %651 }
 0x1ab   : > { %v654_v23 = vadd.f32 %v652_v22, %v650_v15  ;;  %v663_v25 = vadd.f32 %v661_v19, %v645_v10 }
 0x1ad   : > { %v658_v26 = vadd.f32 %v656_v51, %v654_v23 }
 0x1ae   : > { %v665_v28 = vpop.permute.xlu0 %664  ;;  %v669_v33 = vpop.permute.xlu1 %668 }
 0x1af   : > { %v672_v29 = vmul.f32 0.0009765625, %v658_v26  ;;  %v667_v30 = vadd.f32 %v665_v28, %v663_v25 }
 0x1b1   : > { %v671_v37 = vadd.f32 %v669_v33, %v667_v30  ;;  %v674_v41 = vmul.f32 %v672_v29, %v672_v29 }
 0x1b3   : > { %v673_v42 = vmul.f32 0.0009765625, %v671_v37 }
 0x1b5   : > { %v675_v43 = vsub.f32 %v673_v42, %v674_v41 }
 0x1b7   : > { %v676_v50 = vmax.f32 %v675_v43, 0.0 }
 0x1b9   : > { %v677_v54 = vadd.f32 1e-05, %v676_v50 }
 0x1bb   : > { %1222 = vrsqrt.f32 %v677_v54 }
 0x1c5   : > { %v1223_v55 = vpop.eup %1222 }
 0x1c6   : > { %684 = vrot.lane.b32.xlu1 %v1223_v55, %s1235_s20  ;;  %681 = vrot.lane.b32.xlu0 %v1223_v55, %s1236_s21  ;;  %v679_v56 = vmul.f32 %v1223_v55, %v672_v29 }
 0x1ca   : > { %687 = vrot.lane.b32.xlu0 %v1223_v55, %s1237_s22  ;;  %696 = vrot.lane.b32.xlu1 %v679_v56, %s1236_s21 }
 0x1ce   : > { %699 = vrot.lane.b32.xlu0 %v679_v56, %s1235_s20  ;;  %702 = vrot.lane.b32.xlu1 %v679_v56, %s1237_s22 }
 0x238   : > { %v682_v59 = vpop.permute.xlu0 %681  ;;  %v685_v60 = vpop.permute.xlu1 %684 }
 0x239   : > { %v691_v61 = vsel %vm690_vm2, %v1223_v55, %v682_v59 }
 0x23a   : > { %v692_v1 = vsel %vm265_vm0, %v691_v61, %v685_v60 }
 0x23c   : > { %v688_v3 = vpop.permute.xlu0 %687  ;;  %v697_v7 = vpop.permute.xlu1 %696 }
 0x23d   : > { %v694_v5 = vsel %vm693_vm3, %v692_v1, %v688_v3  ;;  %v705_v15 = vsel %vm690_vm2, %v679_v56, %v697_v7 }
 0x23e   : > { %v711_v6 = vrot.slane %v694_v5, %v710_v62 }
 0x240   : > { %v1536_v10 = vmul.f32 %v711_v6, %v1308_v18  ;;  %v1539_v51 = vmul.f32 %v711_v6, %v1314_v21  ;;  %v1542_v14 = vmul.f32 %v1306_v17, %v711_v6  ;;  %v1545_v19 = vmul.f32 %v1312_v20, %v711_v6 }
 0x241   : > { %v1548_v22 = vmul.f32 %v711_v6, %v1337_v38  ;;  %v1551_v23 = vmul.f32 %v711_v6, %v1350_v48  ;;  %v1554_v25 = vmul.f32 %v1333_v35, %v711_v6  ;;  %v1557_v18 = vmul.f32 %v1346_v44, %v711_v6  ;;  %v700_v38 = vpop.permute.xlu0 %699 }
 0x242   : > { %v1560_v21 = vmul.f32 %v711_v6, %v1373_v2  ;;  %v1563_v17 = vmul.f32 %v711_v6, %v1386_v12  ;;  %v1566_v20 = vmul.f32 %v1369_v63, %v711_v6  ;;  %v1569_v26 = vmul.f32 %v1382_v8, %v711_v6  ;;  %v703_v2 = vpop.permute.xlu1 %702 }
 0x243   : > { %v1572_v48 = vmul.f32 %v711_v6, %v1409_v34  ;;  %v1575_v35 = vmul.f32 %v711_v6, %v1422_v52  ;;  %v1578_v44 = vmul.f32 %v1405_v31, %v711_v6  ;;  %v1581_v12 = vmul.f32 %v1418_v46, %v711_v6 }
 0x244   : > { %v1584_v63 = vmul.f32 %v711_v6, %v1339_v40  ;;  %v1587_v28 = vmul.f32 %v711_v6, %v1352_v49  ;;  %v1590_v8 = vmul.f32 %v1335_v36, %v711_v6  ;;  %v1593_v34 = vmul.f32 %v1348_v45, %v711_v6 }
 0x245   : > { %v1596_v52 = vmul.f32 %v711_v6, %v1375_v4  ;;  %v1599_v31 = vmul.f32 %v711_v6, %v1388_v13  ;;  %v706_v46 = vsel %vm265_vm0, %v705_v15, %v700_v38  ;;  %v1603_v40 = vmul.f32 %v1371_v0, %v711_v6 }
 0x246   : > { %v1606_v49 = vmul.f32 %v1384_v9, %v711_v6  ;;  %v1609_v36 = vmul.f32 %v711_v6, %v1411_v39  ;;  %v707_v45 = vsel %vm693_vm3, %v706_v46, %v703_v2  ;;  %v1613_v29 = vmul.f32 %v711_v6, %v1424_v53 }
 0x247   : > { %v1616_v4 = vmul.f32 %v1407_v32, %v711_v6  ;;  %v1619_v13 = vmul.f32 %v1420_v47, %v711_v6  ;;  %v1621_v30 = vrot.slane %v707_v45, %v710_v62  ;;  %v1624_v0 = vmul.f32 %v711_v6, %v1447_v16 }
 0x248   : > { %v1627_v9 = vmul.f32 %v711_v6, %v1455_v27  ;;  %v1630_v39 = vmul.f32 %v1445_v11, %v711_v6  ;;  %v1633_v53 = vmul.f32 %v1453_v24, %v711_v6 }
 0x249   : > { %v748_v32 = vsub.f32 %v1536_v10, %v1621_v30  ;;  %v749_v47 = vsub.f32 %v1539_v51, %v1621_v30  ;;  %v750_v33 = vsub.f32 %v1542_v14, %v1621_v30  ;;  %v751_v16 = vsub.f32 %v1545_v19, %v1621_v30 }
 0x24a   : > { %v752_v27 = vsub.f32 %v1548_v22, %v1621_v30  ;;  %v753_v11 = vsub.f32 %v1551_v23, %v1621_v30  ;;  %v754_v24 = vsub.f32 %v1554_v25, %v1621_v30  ;;  %v755_v37 = vsub.f32 %v1557_v18, %v1621_v30 }
 0x24b   : > { %v756_v41 = vsub.f32 %v1560_v21, %v1621_v30  ;;  %v757_v42 = vsub.f32 %v1563_v17, %v1621_v30  ;;  %v758_v43 = vsub.f32 %v1566_v20, %v1621_v30  ;;  %v759_v50 = vsub.f32 %v1569_v26, %v1621_v30 }
 0x24c   : > { %v760_v54 = vsub.f32 %v1572_v48, %v1621_v30  ;;  %v761_v55 = vsub.f32 %v1575_v35, %v1621_v30  ;;  %v762_v56 = vsub.f32 %v1578_v44, %v1621_v30  ;;  %v763_v57 = vsub.f32 %v1581_v12, %v1621_v30 }
 0x24d   : > { %v764_v58 = vsub.f32 %v1584_v63, %v1621_v30  ;;  %v765_v59 = vsub.f32 %v1587_v28, %v1621_v30  ;;  %v766_v60 = vsub.f32 %v1590_v8, %v1621_v30  ;;  %v767_v61 = vsub.f32 %v1593_v34, %v1621_v30 }
 0x24e   : > { %v768_v62 = vsub.f32 %v1596_v52, %v1621_v30  ;;  %v769_v1 = vsub.f32 %v1599_v31, %v1621_v30  ;;  %v770_v3 = vsub.f32 %v1603_v40, %v1621_v30  ;;  %v771_v5 = vsub.f32 %v1606_v49, %v1621_v30 }
 0x24f   : > { %v772_v6 = vsub.f32 %v1609_v36, %v1621_v30  ;;  %v773_v7 = vsub.f32 %v1613_v29, %v1621_v30  ;;  %v774_v10 = vsub.f32 %v1616_v4, %v1621_v30  ;;  %v775_v51 = vsub.f32 %v1619_v13, %v1621_v30 }
 0x250   : > { %v776_v14 = vsub.f32 %v1624_v0, %v1621_v30  ;;  %v777_v15 = vsub.f32 %v1627_v9, %v1621_v30  ;;  %v778_v19 = vsub.f32 %v1630_v39, %v1621_v30  ;;  %v779_v22 = vsub.f32 %v1633_v53, %v1621_v30 }
 0x251   : > { %v780_v23 = vmax.f32 %v748_v32, 0.0  ;;  %v781_v25 = vmax.f32 %v749_v47, 0.0  ;;  %v782_v18 = vmax.f32 %v750_v33, 0.0  ;;  %v783_v21 = vmax.f32 %v751_v16, 0.0 }
 0x252   : > { %v784_v17 = vmax.f32 %v752_v27, 0.0  ;;  %v785_v20 = vmax.f32 %v753_v11, 0.0  ;;  %v786_v38 = vmax.f32 %v754_v24, 0.0  ;;  %v787_v26 = vmax.f32 %v755_v37, 0.0 }
 0x253   : > { %v788_v48 = vmax.f32 %v756_v41, 0.0  ;;  %v789_v35 = vmax.f32 %v757_v42, 0.0  ;;  %v790_v44 = vmax.f32 %v758_v43, 0.0  ;;  %v791_v2 = vmax.f32 %v759_v50, 0.0 }
 0x254   : > { %v792_v12 = vmax.f32 %v760_v54, 0.0  ;;  %v793_v63 = vmax.f32 %v761_v55, 0.0  ;;  %v794_v28 = vmax.f32 %v762_v56, 0.0  ;;  %v795_v8 = vmax.f32 %v763_v57, 0.0 }
 0x255   : > { %v796_v34 = vmax.f32 %v764_v58, 0.0  ;;  %v797_v52 = vmax.f32 %v765_v59, 0.0  ;;  %v798_v31 = vmax.f32 %v766_v60, 0.0  ;;  %v799_v46 = vmax.f32 %v767_v61, 0.0 }
 0x256   : > { %v1699_v40 = vmax.f32 %v768_v62, 0.0  ;;  %v1701_v49 = vmax.f32 %v769_v1, 0.0  ;;  %v1703_v36 = vmax.f32 %v770_v3, 0.0  ;;  %v1705_v45 = vmax.f32 %v771_v5, 0.0 }
 0x257   : > { %v1707_v29 = vmax.f32 %v772_v6, 0.0  ;;  %v1709_v4 = vmax.f32 %v773_v7, 0.0  ;;  %v1711_v13 = vmax.f32 %v774_v10, 0.0  ;;  %v1713_v30 = vmax.f32 %v775_v51, 0.0 }
 0x258   : > { %v1722_v0 = vmax.f32 %v776_v14, 0.0  ;;  %v1724_v9 = vmax.f32 %v777_v15, 0.0  ;;  %v1726_v39 = vmax.f32 %v778_v19, 0.0  ;;  %v1728_v53 = vmax.f32 %v779_v22, 0.0 }
 0x259   : > { %v1106_v32 = vpack.c.bf16 %v780_v23, %v780_v23  ;;  %v1107_v47 = vpack.c.bf16 %v781_v25, %v781_v25  ;;  %v1108_v33 = vpack.c.bf16 %v782_v18, %v782_v18  ;;  %v1109_v16 = vpack.c.bf16 %v783_v21, %v783_v21 }
 0x25a   : > { %v1110_v27 = vpack.c.bf16 %v784_v17, %v784_v17  ;;  %v1111_v11 = vpack.c.bf16 %v785_v20, %v785_v20  ;;  %v1112_v24 = vpack.c.bf16 %v786_v38, %v786_v38  ;;  %v1113_v37 = vpack.c.bf16 %v787_v26, %v787_v26 }
 0x25b   : > { %v1114_v41 = vpack.c.bf16 %v788_v48, %v788_v48  ;;  %v1115_v42 = vpack.c.bf16 %v789_v35, %v789_v35  ;;  %v1116_v43 = vpack.c.bf16 %v790_v44, %v790_v44  ;;  %v1117_v50 = vpack.c.bf16 %v791_v2, %v791_v2  ;;  %941 = vst.msk [vmem:[%s1720_s25] sm:$0xf] %vm940_vm4, %v1106_v32 }
 0x25c   : > { %942 = vst.msk [vmem:[%s1720_s25 + $0x4] sm:$0xf] %vm940_vm4, %v1107_v47  ;;  %943 = vst.msk [vmem:[%s1720_s25 + $0x8] sm:$0xf] %vm940_vm4, %v1108_v33  ;;  %v1118_v54 = vpack.c.bf16 %v792_v12, %v792_v12  ;;  %v1119_v55 = vpack.c.bf16 %v793_v63, %v793_v63  ;;  %v1120_v56 = vpack.c.bf16 %v794_v28, %v794_v28 }
 0x25d   : > { %944 = vst.msk [vmem:[%s1720_s25 + $0xc] sm:$0xf] %vm940_vm4, %v1109_v16  ;;  %v1121_v57 = vpack.c.bf16 %v795_v8, %v795_v8  ;;  %945 = vst.msk [vmem:[%s1720_s25 + $0x10] sm:$0xf] %vm940_vm4, %v1110_v27  ;;  %v1122_v58 = vpack.c.bf16 %v796_v34, %v796_v34  ;;  %v1123_v59 = vpack.c.bf16 %v797_v52, %v797_v52 }
 0x25e   : > { %946 = vst.msk [vmem:[%s1720_s25 + $0x14] sm:$0xf] %vm940_vm4, %v1111_v11  ;;  %947 = vst.msk [vmem:[%s1720_s25 + $0x18] sm:$0xf] %vm940_vm4, %v1112_v24  ;;  %v1124_v60 = vpack.c.bf16 %v798_v31, %v798_v31  ;;  %v1125_v61 = vpack.c.bf16 %v799_v46, %v799_v46  ;;  %v1126_v62 = vpack.c.bf16 %v1699_v40, %v1699_v40 }
 0x25f   : > { %948 = vst.msk [vmem:[%s1720_s25 + $0x1c] sm:$0xf] %vm940_vm4, %v1113_v37  ;;  %949 = vst.msk [vmem:[%s1720_s25 + $0x20] sm:$0xf] %vm940_vm4, %v1114_v41  ;;  %v1127_v1 = vpack.c.bf16 %v1701_v49, %v1701_v49  ;;  %v1128_v3 = vpack.c.bf16 %v1703_v36, %v1703_v36  ;;  %v1129_v5 = vpack.c.bf16 %v1705_v45, %v1705_v45 }
 0x260   : > { %950 = vst.msk [vmem:[%s1720_s25 + $0x24] sm:$0xf] %vm940_vm4, %v1115_v42  ;;  %951 = vst.msk [vmem:[%s1720_s25 + $0x28] sm:$0xf] %vm940_vm4, %v1116_v43  ;;  %v1130_v6 = vpack.c.bf16 %v1707_v29, %v1707_v29  ;;  %v1131_v7 = vpack.c.bf16 %v1709_v4, %v1709_v4  ;;  %v1132_v10 = vpack.c.bf16 %v1711_v13, %v1711_v13 }
 0x261   : > { %952 = vst.msk [vmem:[%s1720_s25 + $0x2c] sm:$0xf] %vm940_vm4, %v1117_v50  ;;  %953 = vst.msk [vmem:[%s1720_s25 + $0x30] sm:$0xf] %vm940_vm4, %v1118_v54  ;;  %v1133_v51 = vpack.c.bf16 %v1713_v30, %v1713_v30  ;;  %v1134_v14 = vpack.c.bf16 %v1722_v0, %v1722_v0  ;;  %v1135_v15 = vpack.c.bf16 %v1724_v9, %v1724_v9 }
 0x262   : > { %954 = vst.msk [vmem:[%s1720_s25 + $0x34] sm:$0xf] %vm940_vm4, %v1119_v55  ;;  %955 = vst.msk [vmem:[%s1720_s25 + $0x38] sm:$0xf] %vm940_vm4, %v1120_v56  ;;  %v1136_v19 = vpack.c.bf16 %v1726_v39, %v1726_v39  ;;  %v1137_v22 = vpack.c.bf16 %v1728_v53, %v1728_v53 }
 0x263   : > { %956 = vst.msk [vmem:[%s1720_s25 + $0x3c] sm:$0xf] %vm940_vm4, %v1121_v57  ;;  %957 = vst.msk [vmem:[%s1720_s25 + $0x40] sm:$0xf] %vm940_vm4, %v1122_v58 }
 0x264   : > { %958 = vst.msk [vmem:[%s1720_s25 + $0x44] sm:$0xf] %vm940_vm4, %v1123_v59  ;;  %959 = vst.msk [vmem:[%s1720_s25 + $0x48] sm:$0xf] %vm940_vm4, %v1124_v60 }
 0x265   : > { %960 = vst.msk [vmem:[%s1720_s25 + $0x4c] sm:$0xf] %vm940_vm4, %v1125_v61  ;;  %961 = vst.msk [vmem:[%s1720_s25 + $0x50] sm:$0xf] %vm940_vm4, %v1126_v62 }
 0x266   : > { %962 = vst.msk [vmem:[%s1720_s25 + $0x54] sm:$0xf] %vm940_vm4, %v1127_v1  ;;  %963 = vst.msk [vmem:[%s1720_s25 + $0x58] sm:$0xf] %vm940_vm4, %v1128_v3 }
 0x267   : > { %964 = vst.msk [vmem:[%s1720_s25 + $0x5c] sm:$0xf] %vm940_vm4, %v1129_v5  ;;  %965 = vst.msk [vmem:[%s1720_s25 + $0x60] sm:$0xf] %vm940_vm4, %v1130_v6 }
 0x268   : > { %966 = vst.msk [vmem:[%s1720_s25 + $0x64] sm:$0xf] %vm940_vm4, %v1131_v7  ;;  %967 = vst.msk [vmem:[%s1720_s25 + $0x68] sm:$0xf] %vm940_vm4, %v1132_v10 }
 0x269   : > { %968 = vst.msk [vmem:[%s1720_s25 + $0x6c] sm:$0xf] %vm940_vm4, %v1133_v51  ;;  %969 = vst.msk [vmem:[%s1720_s25 + $0x70] sm:$0xf] %vm940_vm4, %v1134_v14 }
 0x26a   : > { %970 = vst.msk [vmem:[%s1720_s25 + $0x74] sm:$0xf] %vm940_vm4, %v1135_v15  ;;  %971 = vst.msk [vmem:[%s1720_s25 + $0x78] sm:$0xf] %vm940_vm4, %v1136_v19 }
 0x26b   : > { %972 = vst.msk [vmem:[%s1720_s25 + $0x7c] sm:$0xf] %vm940_vm4, %v1137_v22 }
 0x26c PF: > { %s12_s9 = sadd.s32 1, %s1230_s9  }
 0x26d   : > { %p9_p4 = scmp.ge.s32.totalorder %s12_s9, 4  }
 0x26f   :  { %11 = sbr.rel (!%p9_p4) target bundleno = 1 (0x1), region = 58 }

</bundles_post_ra>
